<compile_context>
chip_gen: v7x
topology: tpu7x:2x2x1
jax: 0.10.0
libtpu: 0.0.40
codegen_flags: <defaults>
</compile_context>

<pallas_src>
import math

import jax
import jax.numpy as jnp
from jax.experimental import pallas as pl
from jax.experimental.pallas import tpu as pltpu


_MIN_ELEMS_FOR_KERNEL = 1024           # below one (8,128) vreg tile: launch overhead dominates
_BLOCK_BYTE_BUDGET = 2 * 1024 * 1024   # ~2 MiB/block; x2 (in+out) x2 (double buffer) ~= 8 MiB VMEM
_CANDIDATE_COLS = (2048, 1024, 512, 256, 128)


def _identity_kernel(x_ref, o_ref):
    # The whole forward pass: o = x
    o_ref[...] = x_ref[...]


def _pick_lane_dense_cols(total: int):
    """Largest candidate multiple of 128 dividing `total`, preferring views with >=8 rows."""
    best = None
    for c in _CANDIDATE_COLS:
        if total % c == 0:
            if best is None:
                best = c
            if total // c >= 8:
                return c
    return best


def _choose_block_rows(rows: int, cols: int, itemsize: int) -> int:
    budget_rows = _BLOCK_BYTE_BUDGET // max(1, cols * itemsize)
    if budget_rows >= rows:
        return rows                        # one block covering all rows (full extent is always legal)
    # A multiple of 32 sublanes satisfies the sublane tiling constraint for
    # f32 (8), bf16 (16) and int8/fp8 (32) packing.
    block_rows = max(32, (budget_rows // 32) * 32)
    return min(block_rows, rows)


def _identity_copy_2d(x2: jax.Array) -> jax.Array:
    rows, cols = x2.shape
    block_rows = _choose_block_rows(rows, cols, x2.dtype.itemsize)
    grid = (pl.cdiv(rows, block_rows),)    # ragged last block handled by Pallas

    return pl.pallas_call(
        _identity_kernel,
        out_shape=jax.ShapeDtypeStruct((rows, cols), x2.dtype),
        grid_spec=pltpu.PrefetchScalarGridSpec(
            num_scalar_prefetch=0,
            grid=grid,
            in_specs=[pl.BlockSpec((block_rows, cols), lambda i: (i, 0))],
            out_specs=pl.BlockSpec((block_rows, cols), lambda i: (i, 0)),
        ),
        compiler_params=pltpu.CompilerParams(
            # Shards the row axis across the 2 TensorCores on v7x; measured
            # near-zero cost on single-TC v5e/v6e.
            dimension_semantics=("parallel",),
        ),
        # Output aliases input 0: avoids a fresh HBM output allocation when
        # the caller donates x (XLA inserts a copy only when it must).
        input_output_aliases={0: 0},
    )(x2)


def identity(x: jax.Array) -> jax.Array:
    """Pallas implementation of Identity.forward(x) == x (same shape & dtype)."""
    orig_shape = x.shape
    total = math.prod(orig_shape)

    # Identity is a no-op; for tiny / 0-d / empty inputs the pallas_call launch
    # and pipeline setup cost far exceeds the copy, so just return x.
    if total < _MIN_ELEMS_FOR_KERNEL:
        return x

    cols = _pick_lane_dense_cols(total)
    if cols is not None:
        # Lane-dense view: unmasked full-lane (multiple-of-128) stores.
        x2 = x.reshape(total // cols, cols)
    else:
        # Total not divisible by 128: keep the original trailing dim; a block
        # spanning the full last dim is always legal (may use masked stores).
        x2 = x.reshape(-1, orig_shape[-1])

    out2 = _identity_copy_2d(x2)
    return out2.reshape(orig_shape)


if __name__ == "__main__":
    root = jax.random.PRNGKey(0)
    k0, k1, k2 = jax.random.split(root, 3)

    # Primary: small NCHW input consistent with a conv-style feature provider.
    x = jax.random.normal(k0, (2, 4, 16, 16), dtype=jnp.float32)
    y = identity(x)
    jax.block_until_ready(y)
    assert y.shape == x.shape, (y.shape, x.shape)
    assert y.dtype == x.dtype, (y.dtype, x.dtype)
    assert bool(jnp.all(y == x)), "Identity output mismatch (primary)"

    # Larger input: exercises the lane-dense multi-block path (grid > 1).
    xb = jax.random.normal(k1, (8, 8, 128, 128), dtype=jnp.float32)
    yb = identity(xb)
    jax.block_until_ready(yb)
    assert yb.shape == xb.shape and yb.dtype == xb.dtype
    assert bool(jnp.all(yb == xb)), "Identity output mismatch (multi-block)"

    # Awkward shape (element count not divisible by 128): fallback 2-D view.
    xo = jax.random.normal(k2, (2, 5, 9, 17), dtype=jnp.float32)
    yo = identity(xo)
    jax.block_until_ready(yo)
    assert yo.shape == xo.shape and yo.dtype == xo.dtype
    assert bool(jnp.all(yo == xo)), "Identity output mismatch (fallback)"

    # Tiny input: takes the no-kernel bypass.
    xt = jnp.arange(7, dtype=jnp.float32)
    yt = identity(xt)
    jax.block_until_ready(yt)
    assert bool(jnp.all(yt == xt)), "Identity output mismatch (bypass)"

    print("KERNEL_OK")
</pallas_src>

<mosaic_0001>
module attributes {stable_mosaic.version = 11 : i64} {
  func.func @_identity_kernel(%arg0: i32, %arg1: memref<8x256xf32, #tpu.memory_space<vmem>>, %arg2: memref<8x256xf32, #tpu.memory_space<vmem>>) attributes {dimension_semantics = [#tpu.dimension_semantics<parallel>], iteration_bounds = array<i64: 1>, scalar_prefetch = 0 : i64, scratch_operands = 0 : i64, tpu.core_type = #tpu.core_type<tc>, window_params = [{transform_indices = @transform_0, window_bounds = array<i64: 8, 256>}, {transform_indices = @transform_1, window_bounds = array<i64: 8, 256>}]} {
    %c0 = arith.constant 0 : index
    %c0_0 = arith.constant 0 : index
    %0 = vector.load %arg1[%c0, %c0_0] : memref<8x256xf32, #tpu.memory_space<vmem>>, vector<8x256xf32>
    %c0_1 = arith.constant 0 : index
    %c0_2 = arith.constant 0 : index
    %1 = vector.load %arg2[%c0_1, %c0_2] : memref<8x256xf32, #tpu.memory_space<vmem>>, vector<8x256xf32>
    tpu.vector_store %arg2[%c0_1, %c0_2], %0 {strides = array<i32>} : memref<8x256xf32, #tpu.memory_space<vmem>>, vector<8x256xf32>,
    return
  }
  func.func @transform_0(%arg0: i32) -> (i32, i32) {
    %c0_i32 = arith.constant 0 : i32
    %c0_i32_0 = arith.constant 0 : i32
    return %arg0, %c0_i32 : i32, i32
  }
  func.func @transform_1(%arg0: i32) -> (i32, i32) {
    %c0_i32 = arith.constant 0 : i32
    %c0_i32_0 = arith.constant 0 : i32
    return %arg0, %c0_i32 : i32, i32
  }
}

</mosaic_0001>

<bundles_post_ra>
// kernel: tpu_custom_call.1
= control target key start
LH: loop header
LB: loop body
LE: loop exit
PB: predicated region body
PF: predicated region fallthrough
CT: control target
= control target key end

     0   :  { %6 = vsyncpa [#allocation3], 0  ;;  %s126_s0 = inlined_call_operand.hbm [shape: f32[8,256], index: 0, kind: input, shape index: {}, may-alias: {0,1}]   ;;  %s127_s1 = inlined_call_operand.hbm [shape: f32[8,256], index: 1, kind: output, shape index: {}, may-alias: {0,1}]  }
   0x1   :  { %7 = vsyncpa [#allocation4], 0  ;;  %s90_s6 = smov [#allocation2]   ;;  %s42_s10 = scalar_lea.hbm %s126_s0, 256 }
   0x2   :  { %s14_s7 = sshll.u32 %s90_s6, 4  ;;  %p43_p0 = scmp.ne.s32.totalorder %s126_s0, %s42_s10  ;;  %s15_s7 = int_to_ptr.vmem [resolvable:$true] %s14_s7 }
   0x3   :  { %p46_p1 = scmp.lt.u32.totalorder %s42_s10, %s126_s0 }
   0x5   :  { %p48_p2 = pnand %p46_p1, %p43_p0 }
   0x7   :  { %51 = shalt.err (!%p48_p2)
}
   0x8   :  { %s52_s15 = scalar_lea.vmem %s15_s7, 256  ;;  %p57_p4 = scmp.lt.s32.totalorder %s15_s7, %s15_s7 }
   0x9   :  { %p53_p3 = scmp.ne.s32.totalorder %s15_s7, %s52_s15  ;;  %p58_p5 = scmp.lt.s32.totalorder %s52_s15, %s52_s15 }
   0xb   :  { %p59_p6 = por %p58_p5, %p57_p4 }
   0xd   :  { %p60_p7 = pnand %p59_p6, %p53_p3 }
   0xf   :  { %63 = shalt.err (!%p60_p7)
}
  0x10   :  { %17 = dma.hbm_to_vmem [thread:$0]  %s126_s0, 256, %s15_s7, [#allocation3]  }
  0x11   :  { %86 = dma.done.wait [#allocation3], 256  }
  0x12   :  { %87 = vsyncadd [#allocation3], 4294967040  ;;  %s91_s18 = smov [#allocation5]   ;;  %v21_v0 = vld [vmem:[#allocation2] sm:$0xff]  ;;  %v22_v1 = vld [vmem:[#allocation2 + $0x8] sm:$0xff] }
  0x13   :  { %s31_s19 = sshll.u32 %s91_s18, 4  ;;  %23 = vst [vmem:[#allocation5] sm:$0xff] %v21_v0  ;;  %24 = vst [vmem:[#allocation5 + $0x8] sm:$0xff] %v22_v1  ;;  %s32_s19 = int_to_ptr.vmem [resolvable:$true] %s31_s19 }
  0x14   :  { %s64_s20 = scalar_lea.vmem %s32_s19, 256  ;;  %p69_p9 = scmp.lt.s32.totalorder %s32_s19, %s32_s19 }
  0x15   :  { %p65_p8 = scmp.ne.s32.totalorder %s32_s19, %s64_s20  ;;  %p70_p10 = scmp.lt.s32.totalorder %s64_s20, %s64_s20 }
  0x17   :  { %p71_p11 = por %p70_p10, %p69_p9 }
  0x19   :  { %p72_p12 = pnand %p71_p11, %p65_p8 }
  0x1b   :  { %75 = shalt.err (!%p72_p12)
}
  0x1c   :  { %s76_s0 = scalar_lea.hbm %s127_s1, 256 }
  0x1d   :  { %p77_p13 = scmp.ne.s32.totalorder %s127_s1, %s76_s0  ;;  %p80_p0 = scmp.lt.u32.totalorder %s76_s0, %s127_s1 }
  0x1f   :  { %p82_p1 = pnand %p80_p0, %p77_p13 }
  0x21   :  { %85 = shalt.err (!%p82_p1)
}
  0x22   :  { %34 = dma.vmem_to_hbm [thread:$0]  %s32_s19, 256, %s127_s1, [#allocation4]  }
  0x23   :  { %88 = dma.done.wait [#allocation4], 256  }
  0x24   :  { %89 = vsyncadd [#allocation4], 4294967040 }
  0x25   :  { %38 = vsyncpa [#allocation3], 1 }
  0x26   :  { %39 = vsyncpa [#allocation4], 1 }

</bundles_post_ra>
